<compile_context>
chip_gen: v6e
topology: v6e:2x2x1
jax: 0.10.0
libtpu: 0.0.40
codegen_flags: <defaults>
</compile_context>

<pallas_src>
import functools

import jax
import jax.numpy as jnp
from jax.experimental import pallas as pl
from jax.experimental.pallas import tpu as pltpu

OUT_PAD = 128  # lane-dense padding for the narrow (out_feat=10) dims


def _gelu_exact(x):
    # PyTorch nn.GELU() default = exact (erf-based) GELU.
    return 0.5 * x * (1.0 + jax.lax.erf(x * 0.7071067811865476))


def cmlp_kernel(x_ref, add_ref,
                w1_ref, b1_ref,          # [D_in, H1], [1, H1]
                w2_ref, b2_ref,          # [H1,  H2], [1, H2]
                w3c1_ref, wc1a_ref, bc1_ref,  # [H2,128], [A,128], [1,128] (fused)
                wc2_ref, bc2_ref,        # [128,128], [1,128]
                out_ref):                # [TN, 128]
    h = _gelu_exact(jnp.dot(x_ref[...], w1_ref[...],
                            preferred_element_type=jnp.float32) + b1_ref[...])
    h = _gelu_exact(jnp.dot(h, w2_ref[...],
                            preferred_element_type=jnp.float32) + b2_ref[...])
    # (h@W3 + b3)@Wc1e + add@Wc1a + bc1  ==  h@(W3@Wc1e) + add@Wc1a + (b3@Wc1e + bc1)
    c = _gelu_exact(
        jnp.dot(h, w3c1_ref[...], preferred_element_type=jnp.float32)
        + jnp.dot(add_ref[...], wc1a_ref[...], preferred_element_type=jnp.float32)
        + bc1_ref[...])
    out = jnp.dot(c, wc2_ref[...],
                  preferred_element_type=jnp.float32) + bc2_ref[...]
    out_ref[...] = out.astype(out_ref.dtype)


def prepare_params(params, out_feat=10):
    """One-time host-side layout + algebraic fusion. Runs OUTSIDE jit."""
    (w1, b1, w2, b2, w3, b3, wc1, bc1, wc2, bc2) = params
    f32 = jnp.float32
    hp = jax.lax.Precision.HIGHEST

    def t(w):
        return jnp.transpose(w, (1, 0)).astype(f32)

    def pad_cols(m, to):
        return jnp.pad(m, ((0, 0), (0, to - m.shape[1])))

    def pad_rows(m, to):
        return jnp.pad(m, ((0, to - m.shape[0]), (0, 0)))

    def row(v, to=None):
        r = v.reshape(1, -1).astype(f32)
        if to is not None:
            r = jnp.pad(r, ((0, 0), (0, to - r.shape[1])))
        return r

    w1_k, b1_k = t(w1), row(b1)
    w2_k, b2_k = t(w2), row(b2)

    w3_t = t(w3)                                   # [H2, out_feat]
    wc1_t = t(wc1)                                 # [out_feat + A, out_feat]
    wc1e = wc1_t[:out_feat]                        # [out_feat, out_feat]
    wc1a = wc1_t[out_feat:]                        # [A, out_feat]

    # Fuse the trunk's last Linear with the emb-half of the head's first Linear.
    w3c1 = jnp.dot(w3_t, wc1e, precision=hp)                       # [H2, out_feat]
    bc1f = bc1.astype(f32) + jnp.dot(b3.astype(f32), wc1e, precision=hp)

    w3c1_k = pad_cols(w3c1, OUT_PAD)                               # [H2, 128]
    wc1a_k = pad_cols(wc1a.astype(f32), OUT_PAD)                   # [A, 128]
    bc1_k = row(bc1f, OUT_PAD)                                     # [1, 128]
    wc2_k = pad_rows(pad_cols(t(wc2), OUT_PAD), OUT_PAD)           # [128, 128]
    bc2_k = row(bc2, OUT_PAD)                                      # [1, 128]
    return (w1_k, b1_k, w2_k, b2_k, w3c1_k, wc1a_k, bc1_k, wc2_k, bc2_k)


@functools.partial(jax.jit, static_argnames=("out_feat",))
def cmlp_forward(x, add_x, prepared, out_feat=10):
    """x: [N, input_dim], add_x: [N, additional_dim]. Returns [N, out_feat]."""
    (w1, b1, w2, b2, w3c1, wc1a, bc1, wc2, bc2) = prepared
    N, D_in = x.shape
    A = add_x.shape[1]
    H1, H2 = w1.shape[1], w2.shape[1]

    # Static N tiling: round N up to a multiple of 8, cap row-block at 256.
    N8 = max(8, -(-N // 8) * 8)
    TN = min(256, N8)
    N_pad = -(-N8 // TN) * TN

    x_p = jnp.pad(x, ((0, N_pad - N), (0, 0)))
    a_p = jnp.pad(add_x, ((0, N_pad - N), (0, 0)))

    def pinned(shape):
        return pl.BlockSpec(shape, lambda i: (0, 0))

    flops = 2 * N_pad * (D_in * H1 + H1 * H2 + H2 * OUT_PAD
                         + A * OUT_PAD + OUT_PAD * OUT_PAD)
    transcendentals = N_pad * (H1 + H2 + OUT_PAD)
    bytes_accessed = 4 * (x_p.size + a_p.size
                          + sum(int(p.size) for p in prepared)
                          + N_pad * OUT_PAD)

    out = pl.pallas_call(
        cmlp_kernel,
        out_shape=jax.ShapeDtypeStruct((N_pad, OUT_PAD), jnp.float32),
        grid=(N_pad // TN,),
        in_specs=[
            pl.BlockSpec((TN, D_in), lambda i: (i, 0)),   # x block per grid step
            pl.BlockSpec((TN, A), lambda i: (i, 0)),      # additional_x block
            pinned((D_in, H1)), pinned((1, H1)),
            pinned((H1, H2)), pinned((1, H2)),
            pinned((H2, OUT_PAD)), pinned((A, OUT_PAD)), pinned((1, OUT_PAD)),
            pinned((OUT_PAD, OUT_PAD)), pinned((1, OUT_PAD)),
        ],
        out_specs=pl.BlockSpec((TN, OUT_PAD), lambda i: (i, 0)),
        compiler_params=pltpu.CompilerParams(
            dimension_semantics=("parallel",)),
        cost_estimate=pl.CostEstimate(flops=flops,
                                      transcendentals=transcendentals,
                                      bytes_accessed=bytes_accessed),
    )(x_p, a_p, w1, b1, w2, b2, w3c1, wc1a, bc1, wc2, bc2)
    return out[:N, :out_feat]


def cmlp_ref(x, add_x, params):
    """Pure-JAX reference in PyTorch layouts/order (for parity check)."""
    (w1, b1, w2, b2, w3, b3, wc1, bc1, wc2, bc2) = params
    hp = jax.lax.Precision.HIGHEST
    h = _gelu_exact(jnp.dot(x, w1.T, precision=hp) + b1)
    h = _gelu_exact(jnp.dot(h, w2.T, precision=hp) + b2)
    emb = jnp.dot(h, w3.T, precision=hp) + b3
    c = jnp.concatenate([emb, add_x], axis=1)
    c = _gelu_exact(jnp.dot(c, wc1.T, precision=hp) + bc1)
    return jnp.dot(c, wc2.T, precision=hp) + bc2


def init_params(key, input_dim, additional_dim, hidden=(256, 256), out_feat=10):
    """Deterministic synthetic params in PyTorch layouts: weight (out,in), bias (out,)."""
    ch = [input_dim] + list(hidden) + [out_feat]
    shapes = [(ch[i + 1], ch[i]) for i in range(len(ch) - 1)]
    shapes += [(out_feat, out_feat + additional_dim), (out_feat, out_feat)]
    params = []
    for (o, i) in shapes:
        key, kw, kb = jax.random.split(key, 3)
        scale = 1.0 / (float(i) ** 0.5)
        params.append(jax.random.uniform(kw, (o, i), jnp.float32, -scale, scale))
        params.append(jax.random.uniform(kb, (o,), jnp.float32, -scale, scale))
    return tuple(params)


if __name__ == "__main__":
    N, D_IN, A = 2, 32, 8                     # batch=2, input_dim=32, additional_dim=8
    key = jax.random.PRNGKey(0)
    key, kx, ka = jax.random.split(key, 3)
    x = jax.random.normal(kx, (N, D_IN), jnp.float32)
    add_x = jax.random.normal(ka, (N, A), jnp.float32)
    params = init_params(key, D_IN, A)

    prepared = prepare_params(params)          # one-time weight layout + fusion
    out = cmlp_forward(x, add_x, prepared)
    jax.block_until_ready(out)
    assert out.shape == (N, 10), out.shape

    ref = cmlp_ref(x, add_x, params)
    assert jnp.allclose(out, ref, atol=1e-3, rtol=1e-3), \
        float(jnp.max(jnp.abs(out - ref)))
    print("KERNEL_OK")
</pallas_src>

<mosaic_0001>
module attributes {stable_mosaic.version = 11 : i64} {
  func.func @cmlp_kernel(%arg0: i32, %arg1: memref<8x32xf32, #tpu.memory_space<vmem>>, %arg2: memref<8x8xf32, #tpu.memory_space<vmem>>, %arg3: memref<32x256xf32, #tpu.memory_space<vmem>>, %arg4: memref<1x256xf32, #tpu.memory_space<vmem>>, %arg5: memref<256x256xf32, #tpu.memory_space<vmem>>, %arg6: memref<1x256xf32, #tpu.memory_space<vmem>>, %arg7: memref<256x128xf32, #tpu.memory_space<vmem>>, %arg8: memref<8x128xf32, #tpu.memory_space<vmem>>, %arg9: memref<1x128xf32, #tpu.memory_space<vmem>>, %arg10: memref<128x128xf32, #tpu.memory_space<vmem>>, %arg11: memref<1x128xf32, #tpu.memory_space<vmem>>, %arg12: memref<8x128xf32, #tpu.memory_space<vmem>>) attributes {dimension_semantics = [#tpu.dimension_semantics<parallel>], iteration_bounds = array<i64: 1>, scalar_prefetch = 0 : i64, scratch_operands = 0 : i64, tpu.core_type = #tpu.core_type<tc>, window_params = [{transform_indices = @transform_0, window_bounds = array<i64: 8, 32>}, {transform_indices = @transform_1, window_bounds = array<i64: 8, 8>}, {pipeline_mode = #tpu.pipeline_mode<synchronous>, transform_indices = @transform_2, window_bounds = array<i64: 32, 256>}, {pipeline_mode = #tpu.pipeline_mode<synchronous>, transform_indices = @transform_3, window_bounds = array<i64: 1, 256>}, {pipeline_mode = #tpu.pipeline_mode<synchronous>, transform_indices = @transform_4, window_bounds = array<i64: 256, 256>}, {pipeline_mode = #tpu.pipeline_mode<synchronous>, transform_indices = @transform_5, window_bounds = array<i64: 1, 256>}, {pipeline_mode = #tpu.pipeline_mode<synchronous>, transform_indices = @transform_6, window_bounds = array<i64: 256, 128>}, {pipeline_mode = #tpu.pipeline_mode<synchronous>, transform_indices = @transform_7, window_bounds = array<i64: 8, 128>}, {pipeline_mode = #tpu.pipeline_mode<synchronous>, transform_indices = @transform_8, window_bounds = array<i64: 1, 128>}, {pipeline_mode = #tpu.pipeline_mode<synchronous>, transform_indices = @transform_9, window_bounds = array<i64: 128, 128>}, {pipeline_mode = #tpu.pipeline_mode<synchronous>, transform_indices = @transform_10, window_bounds = array<i64: 1, 128>}, {transform_indices = @transform_11, window_bounds = array<i64: 8, 128>}]} {
    %c0 = arith.constant 0 : index
    %c0_0 = arith.constant 0 : index
    %0 = vector.load %arg1[%c0, %c0_0] : memref<8x32xf32, #tpu.memory_space<vmem>>, vector<8x32xf32>
    %c0_1 = arith.constant 0 : index
    %c0_2 = arith.constant 0 : index
    %1 = vector.load %arg3[%c0_1, %c0_2] : memref<32x256xf32, #tpu.memory_space<vmem>>, vector<32x256xf32>
    %cst = arith.constant dense<0.000000e+00> : vector<8x256xf32>
    %2 = tpu.matmul %0, %1, %cst {dimension_numbers = #tpu.dot_dimension_numbers<[1], [0], [0], [1], [0, 0, 1, 1], [], []>} : vector<8x32xf32>, vector<32x256xf32>, vector<8x256xf32> -> vector<8x256xf32>
    %c0_3 = arith.constant 0 : index
    %c0_4 = arith.constant 0 : index
    %3 = vector.load %arg4[%c0_3, %c0_4] : memref<1x256xf32, #tpu.memory_space<vmem>>, vector<1x256xf32>
    %4 = vector.broadcast %3 : vector<1x256xf32> to vector<8x256xf32>
    %5 = arith.addf %2, %4 : vector<8x256xf32>
    %cst_5 = arith.constant 5.000000e-01 : f32
    %6 = vector.broadcast %cst_5 : f32 to vector<8x256xf32>
    %7 = arith.mulf %6, %5 : vector<8x256xf32>
    %cst_6 = arith.constant 0.707106769 : f32
    %8 = vector.broadcast %cst_6 : f32 to vector<8x256xf32>
    %9 = arith.mulf %5, %8 : vector<8x256xf32>
    %10 = math.erf %9 : vector<8x256xf32>
    %cst_7 = arith.constant 1.000000e+00 : f32
    %11 = vector.broadcast %cst_7 : f32 to vector<8x256xf32>
    %12 = arith.addf %11, %10 : vector<8x256xf32>
    %13 = arith.mulf %7, %12 : vector<8x256xf32>
    %c0_8 = arith.constant 0 : index
    %c0_9 = arith.constant 0 : index
    %14 = vector.load %arg5[%c0_8, %c0_9] : memref<256x256xf32, #tpu.memory_space<vmem>>, vector<256x256xf32>
    %cst_10 = arith.constant dense<0.000000e+00> : vector<8x256xf32>
    %15 = tpu.matmul %13, %14, %cst_10 {dimension_numbers = #tpu.dot_dimension_numbers<[1], [0], [0], [1], [0, 0, 1, 1], [], []>} : vector<8x256xf32>, vector<256x256xf32>, vector<8x256xf32> -> vector<8x256xf32>
    %c0_11 = arith.constant 0 : index
    %c0_12 = arith.constant 0 : index
    %16 = vector.load %arg6[%c0_11, %c0_12] : memref<1x256xf32, #tpu.memory_space<vmem>>, vector<1x256xf32>
    %17 = vector.broadcast %16 : vector<1x256xf32> to vector<8x256xf32>
    %18 = arith.addf %15, %17 : vector<8x256xf32>
    %cst_13 = arith.constant 5.000000e-01 : f32
    %19 = vector.broadcast %cst_13 : f32 to vector<8x256xf32>
    %20 = arith.mulf %19, %18 : vector<8x256xf32>
    %cst_14 = arith.constant 0.707106769 : f32
    %21 = vector.broadcast %cst_14 : f32 to vector<8x256xf32>
    %22 = arith.mulf %18, %21 : vector<8x256xf32>
    %23 = math.erf %22 : vector<8x256xf32>
    %cst_15 = arith.constant 1.000000e+00 : f32
    %24 = vector.broadcast %cst_15 : f32 to vector<8x256xf32>
    %25 = arith.addf %24, %23 : vector<8x256xf32>
    %26 = arith.mulf %20, %25 : vector<8x256xf32>
    %c0_16 = arith.constant 0 : index
    %c0_17 = arith.constant 0 : index
    %27 = vector.load %arg7[%c0_16, %c0_17] : memref<256x128xf32, #tpu.memory_space<vmem>>, vector<256x128xf32>
    %cst_18 = arith.constant dense<0.000000e+00> : vector<8x128xf32>
    %28 = tpu.matmul %26, %27, %cst_18 {dimension_numbers = #tpu.dot_dimension_numbers<[1], [0], [0], [1], [0, 0, 1, 1], [], []>} : vector<8x256xf32>, vector<256x128xf32>, vector<8x128xf32> -> vector<8x128xf32>
    %c0_19 = arith.constant 0 : index
    %c0_20 = arith.constant 0 : index
    %29 = vector.load %arg2[%c0_19, %c0_20] : memref<8x8xf32, #tpu.memory_space<vmem>>, vector<8x8xf32>
    %c0_21 = arith.constant 0 : index
    %c0_22 = arith.constant 0 : index
    %30 = vector.load %arg8[%c0_21, %c0_22] : memref<8x128xf32, #tpu.memory_space<vmem>>, vector<8x128xf32>
    %cst_23 = arith.constant dense<0.000000e+00> : vector<8x128xf32>
    %31 = tpu.matmul %29, %30, %cst_23 {dimension_numbers = #tpu.dot_dimension_numbers<[1], [0], [0], [1], [0, 0, 1, 1], [], []>} : vector<8x8xf32>, vector<8x128xf32>, vector<8x128xf32> -> vector<8x128xf32>
    %32 = arith.addf %28, %31 : vector<8x128xf32>
    %c0_24 = arith.constant 0 : index
    %c0_25 = arith.constant 0 : index
    %33 = vector.load %arg9[%c0_24, %c0_25] : memref<1x128xf32, #tpu.memory_space<vmem>>, vector<1x128xf32>
    %34 = vector.broadcast %33 : vector<1x128xf32> to vector<8x128xf32>
    %35 = arith.addf %32, %34 : vector<8x128xf32>
    %cst_26 = arith.constant 5.000000e-01 : f32
    %36 = vector.broadcast %cst_26 : f32 to vector<8x128xf32>
    %37 = arith.mulf %36, %35 : vector<8x128xf32>
    %cst_27 = arith.constant 0.707106769 : f32
    %38 = vector.broadcast %cst_27 : f32 to vector<8x128xf32>
    %39 = arith.mulf %35, %38 : vector<8x128xf32>
    %40 = math.erf %39 : vector<8x128xf32>
    %cst_28 = arith.constant 1.000000e+00 : f32
    %41 = vector.broadcast %cst_28 : f32 to vector<8x128xf32>
    %42 = arith.addf %41, %40 : vector<8x128xf32>
    %43 = arith.mulf %37, %42 : vector<8x128xf32>
    %c0_29 = arith.constant 0 : index
    %c0_30 = arith.constant 0 : index
    %44 = vector.load %arg10[%c0_29, %c0_30] : memref<128x128xf32, #tpu.memory_space<vmem>>, vector<128x128xf32>
    %cst_31 = arith.constant dense<0.000000e+00> : vector<8x128xf32>
    %45 = tpu.matmul %43, %44, %cst_31 {dimension_numbers = #tpu.dot_dimension_numbers<[1], [0], [0], [1], [0, 0, 1, 1], [], []>} : vector<8x128xf32>, vector<128x128xf32>, vector<8x128xf32> -> vector<8x128xf32>
    %c0_32 = arith.constant 0 : index
    %c0_33 = arith.constant 0 : index
    %46 = vector.load %arg11[%c0_32, %c0_33] : memref<1x128xf32, #tpu.memory_space<vmem>>, vector<1x128xf32>
    %47 = vector.broadcast %46 : vector<1x128xf32> to vector<8x128xf32>
    %48 = arith.addf %45, %47 : vector<8x128xf32>
    %c0_34 = arith.constant 0 : index
    %c0_35 = arith.constant 0 : index
    %49 = vector.load %arg12[%c0_34, %c0_35] : memref<8x128xf32, #tpu.memory_space<vmem>>, vector<8x128xf32>
    tpu.vector_store %arg12[%c0_34, %c0_35], %48 {strides = array<i32>} : memref<8x128xf32, #tpu.memory_space<vmem>>, vector<8x128xf32>,
    return
  }
  func.func @transform_0(%arg0: i32) -> (i32, i32) {
    %c0_i32 = arith.constant 0 : i32
    %c0_i32_0 = arith.constant 0 : i32
    return %arg0, %c0_i32 : i32, i32
  }
  func.func @transform_1(%arg0: i32) -> (i32, i32) {
    %c0_i32 = arith.constant 0 : i32
    %c0_i32_0 = arith.constant 0 : i32
    return %arg0, %c0_i32 : i32, i32
  }
  func.func @transform_2(%arg0: i32) -> (i32, i32) {
    %c0_i32 = arith.constant 0 : i32
    %c0_i32_0 = arith.constant 0 : i32
    %c0_i32_1 = arith.constant 0 : i32
    return %c0_i32, %c0_i32_0 : i32, i32
  }
  func.func @transform_3(%arg0: i32) -> (i32, i32) {
    %c0_i32 = arith.constant 0 : i32
    %c0_i32_0 = arith.constant 0 : i32
    %c0_i32_1 = arith.constant 0 : i32
    return %c0_i32, %c0_i32_0 : i32, i32
  }
  func.func @transform_4(%arg0: i32) -> (i32, i32) {
    %c0_i32 = arith.constant 0 : i32
    %c0_i32_0 = arith.constant 0 : i32
    %c0_i32_1 = arith.constant 0 : i32
    return %c0_i32, %c0_i32_0 : i32, i32
  }
  func.func @transform_5(%arg0: i32) -> (i32, i32) {
    %c0_i32 = arith.constant 0 : i32
    %c0_i32_0 = arith.constant 0 : i32
    %c0_i32_1 = arith.constant 0 : i32
    return %c0_i32, %c0_i32_0 : i32, i32
  }
  func.func @transform_6(%arg0: i32) -> (i32, i32) {
    %c0_i32 = arith.constant 0 : i32
    %c0_i32_0 = arith.constant 0 : i32
    %c0_i32_1 = arith.constant 0 : i32
    return %c0_i32, %c0_i32_0 : i32, i32
  }
  func.func @transform_7(%arg0: i32) -> (i32, i32) {
    %c0_i32 = arith.constant 0 : i32
    %c0_i32_0 = arith.constant 0 : i32
    %c0_i32_1 = arith.constant 0 : i32
    return %c0_i32, %c0_i32_0 : i32, i32
  }
  func.func @transform_8(%arg0: i32) -> (i32, i32) {
    %c0_i32 = arith.constant 0 : i32
    %c0_i32_0 = arith.constant 0 : i32
    %c0_i32_1 = arith.constant 0 : i32
    return %c0_i32, %c0_i32_0 : i32, i32
  }
  func.func @transform_9(%arg0: i32) -> (i32, i32) {
    %c0_i32 = arith.constant 0 : i32
    %c0_i32_0 = arith.constant 0 : i32
    %c0_i32_1 = arith.constant 0 : i32
    return %c0_i32, %c0_i32_0 : i32, i32
  }
  func.func @transform_10(%arg0: i32) -> (i32, i32) {
    %c0_i32 = arith.constant 0 : i32
    %c0_i32_0 = arith.constant 0 : i32
    %c0_i32_1 = arith.constant 0 : i32
    return %c0_i32, %c0_i32_0 : i32, i32
  }
  func.func @transform_11(%arg0: i32) -> (i32, i32) {
    %c0_i32 = arith.constant 0 : i32
    %c0_i32_0 = arith.constant 0 : i32
    return %arg0, %c0_i32 : i32, i32
  }
}

</mosaic_0001>

<bundles_post_ra>
// kernel: cmlp_forward.1
= control target key start
LH: loop header
LB: loop body
LE: loop exit
PB: predicated region body
PF: predicated region fallthrough
CT: control target
= control target key end

     0   :  { %16 = vsyncpa [#allocation3], 0  ;;  %s995_s0 = inlined_call_operand.vmem [shape: f32[8,32], index: 0, kind: input, shape index: {}]   ;;  %s996_s1 = inlined_call_operand.vmem [shape: f32[8,8], index: 1, kind: input, shape index: {}]   ;;  %s997_s2 = inlined_call_operand.hbm [shape: f32[32,256], index: 2, kind: input, shape index: {}]   ;;  %s998_s3 = inlined_call_operand.vmem [shape: f32[1,256], index: 3, kind: input, shape index: {}]   ;;  %s999_s4 = inlined_call_operand.hbm [shape: f32[256,256], index: 4, kind: input, shape index: {}]   ;;  %s1000_s5 = inlined_call_operand.vmem [shape: f32[1,256], index: 5, kind: input, shape index: {}]   ;;  %s1001_s6 = inlined_call_operand.hbm [shape: f32[256,128], index: 6, kind: input, shape index: {}]   ;;  %s1002_s7 = inlined_call_operand.vmem [shape: f32[8,128], index: 7, kind: input, shape index: {}]   ;;  %s1003_s8 = inlined_call_operand.vmem [shape: f32[1,128], index: 8, kind: input, shape index: {}]   ;;  %s1004_s9 = inlined_call_operand.hbm [shape: f32[128,128], index: 9, kind: input, shape index: {}]   ;;  %s1005_s10 = inlined_call_operand.vmem [shape: f32[1,128], index: 10, kind: input, shape index: {}]   ;;  %s1006_s11 = inlined_call_operand.vmem [shape: f32[8,128], index: 11, kind: output, shape index: {}]  }
   0x1   :  { %17 = vsyncpa [#allocation5], 0 }
   0x2   :  { %18 = vsyncpa [#allocation8], 0  ;;  %s852_s17 = smov [#allocation4]   ;;  %s853_s19 = smov [#allocation2]  }
   0x3   :  { %s42_s18 = sshll.u32 %s852_s17, 4  ;;  %s28_s20 = sshll.u32 %s853_s19, 4  ;;  %s43_s18 = int_to_ptr.vmem [resolvable:$true] %s42_s18  ;;  %s29_s20 = int_to_ptr.vmem [resolvable:$true] %s28_s20 }
   0x4   :  { %s774_s21 = scalar_lea.vmem %s43_s18, 8192  ;;  %p779_p1 = scmp.lt.s32.totalorder %s43_s18, %s43_s18 }
   0x5   :  { %p775_p0 = scmp.ne.s32.totalorder %s43_s18, %s774_s21  ;;  %p780_p2 = scmp.lt.s32.totalorder %s774_s21, %s774_s21 }
   0x7   :  { %p781_p3 = por %p780_p2, %p779_p1 }
   0x9   :  { %p782_p4 = pnand %p781_p3, %p775_p0 }
   0xb   :  { %785 = shalt.err (!%p782_p4)
}
   0xc   :  { %s854_s22 = smov 256   ;;  %s855_s23 = smov 16  }
   0xd   :  { %48 = dma.hbm_to_vmem [thread:$0]  %s999_s4, 8192, %s43_s18, [#allocation5], %s854_s22, %s854_s22, %s855_s23  }
   0xe   :  { %s794_s26 = scalar_lea.vmem %s29_s20, 1024  ;;  %p799_p6 = scmp.lt.s32.totalorder %s29_s20, %s29_s20 }
   0xf   :  { %p795_p5 = scmp.ne.s32.totalorder %s29_s20, %s794_s26  ;;  %p800_p7 = scmp.lt.s32.totalorder %s794_s26, %s794_s26 }
  0x11   :  { %p801_p8 = por %p800_p7, %p799_p6 }
  0x13   :  { %p802_p9 = pnand %p801_p8, %p795_p5 }
  0x15   :  { %805 = shalt.err (!%p802_p9)
}
  0x16   :  { %34 = dma.hbm_to_vmem [thread:$0]  %s997_s2, 1024, %s29_s20, [#allocation3], %s854_s22, %s854_s22, %s855_s23  }
  0x17   :  { %s856_s29 = smov [#allocation6]  }
  0x18   :  { %s56_s30 = sshll.u32 %s856_s29, 4  ;;  %s57_s30 = int_to_ptr.vmem [resolvable:$true] %s56_s30 }
  0x19   :  { %s814_s12 = scalar_lea.vmem %s57_s30, 4096  ;;  %p819_p11 = scmp.lt.s32.totalorder %s57_s30, %s57_s30 }
  0x1a   :  { %p815_p10 = scmp.ne.s32.totalorder %s57_s30, %s814_s12  ;;  %p820_p12 = scmp.lt.s32.totalorder %s814_s12, %s814_s12 }
  0x1c   :  { %p821_p13 = por %p820_p12, %p819_p11 }
  0x1e   :  { %p822_p0 = pnand %p821_p13, %p815_p10 }
  0x20   :  { %825 = shalt.err (!%p822_p0)
}
  0x21   :  { %s857_s4 = smov 128   ;;  %s858_s13 = smov 8  }
  0x22   :  { %62 = dma.hbm_to_vmem [thread:$0]  %s1001_s6, 4096, %s57_s30, [#allocation5], %s857_s4, %s857_s4, %s858_s13  }
  0x23   :  { %s859_s16 = smov [#allocation7]  }
  0x24   :  { %s72_s17 = sshll.u32 %s859_s16, 4  ;;  %s73_s17 = int_to_ptr.vmem [resolvable:$true] %s72_s17 }
  0x25   :  { %s834_s2 = scalar_lea.vmem %s73_s17, 2048  ;;  %p839_p2 = scmp.lt.s32.totalorder %s73_s17, %s73_s17 }
  0x26   :  { %p835_p1 = scmp.ne.s32.totalorder %s73_s17, %s834_s2  ;;  %p840_p3 = scmp.lt.s32.totalorder %s834_s2, %s834_s2 }
  0x28   :  { %p841_p4 = por %p840_p3, %p839_p2 }
  0x2a   :  { %p842_p5 = pnand %p841_p4, %p835_p1 }
  0x2c   :  { %845 = shalt.err (!%p842_p5)
}
  0x2d   :  { %78 = dma.hbm_to_vmem [thread:$0]  %s1004_s9, 2048, %s73_s17, [#allocation8], %s857_s4, %s857_s4, %s858_s13  }
  0x2e   :  { %846 = dma.done.wait [#allocation3], 1024  }
  0x2f   :  { %847 = vsyncadd [#allocation3], 4294966272 }
  0x30   :  { %848 = dma.done.wait [#allocation5], 12288  }
  0x31   :  { %849 = vsyncadd [#allocation5], 4294955008 }
  0x32   :  { %850 = dma.done.wait [#allocation8], 2048  }
  0x33   :  { %851 = vsyncadd [#allocation8], 4294965248  ;;  %v860_v0 = vmov 0.0   ;;  %v101_v1 = vld [vmem:[#allocation2 + $0x38] sm:$0xff]  ;;  %v100_v2 = vld [vmem:[#allocation2 + $0x30] sm:$0xff]  ;;  %vm114_vm0 = vcmask 261120  }
  0x34   :  { %182 = vmatprep.mubr.f32.mxu1 %v860_v0  ;;  %706 = vmatprep.subr.mxu0 %v860_v0  ;;  %v99_v3 = vld [vmem:[#allocation2 + $0x28] sm:$0xff]  ;;  %v98_v4 = vld [vmem:[#allocation2 + $0x20] sm:$0xff]  ;;  %v97_v5 = vld [vmem:[#allocation2 + $0x18] sm:$0xff]  ;;  %vm390_vm1 = vcmask 64512   ;;  %vm861_vm2 = vmmov 0  }
  0x35   :  { %142 = vmatprep.subr.mxu1 %v101_v1  ;;  %v96_v6 = vld [vmem:[#allocation2 + $0x10] sm:$0xff]  ;;  %v95_v7 = vld [vmem:[#allocation2 + $0x8] sm:$0xff]  ;;  %v94_v8 = vld [vmem:[#allocation2] sm:$0xff]  ;;  %708 = vmatprep.mubr.msk.f32.mxu0 %vm861_vm2, %v860_v0 }
  0x36   :  { %143 = vmatpush1.msra.mxu1 %v100_v2  ;;  %v93_v9 = vld [vmem:[%s995_s0] sm:$0xff]  ;;  %v230_v10 = vld [vmem:[#allocation4 + $0xf8] sm:$0xff]  ;;  %v229_v11 = vld [vmem:[#allocation4 + $0xf0] sm:$0xff] }
  0x37   :  { %144 = vmatprep.subr.mxu1 %v99_v3  ;;  %v228_v12 = vld [vmem:[#allocation4 + $0xe8] sm:$0xff]  ;;  %v227_v13 = vld [vmem:[#allocation4 + $0xe0] sm:$0xff]  ;;  %v226_v14 = vld [vmem:[#allocation4 + $0xd8] sm:$0xff] }
  0x38   :  { %145 = vmatpush1.msra.mxu1 %v98_v4  ;;  %v225_v15 = vld [vmem:[#allocation4 + $0xd0] sm:$0xff]  ;;  %v224_v16 = vld [vmem:[#allocation4 + $0xc8] sm:$0xff]  ;;  %v223_v17 = vld [vmem:[#allocation4 + $0xc0] sm:$0xff] }
  0x39   :  { %146 = vmatprep.subr.mxu1 %v97_v5  ;;  %v222_v18 = vld [vmem:[#allocation4 + $0xb8] sm:$0xff]  ;;  %v221_v19 = vld [vmem:[#allocation4 + $0xb0] sm:$0xff]  ;;  %v220_v20 = vld [vmem:[#allocation4 + $0xa8] sm:$0xff] }
  0x3a   :  { %147 = vmatpush1.msra.mxu1 %v96_v6  ;;  %v219_v21 = vld [vmem:[#allocation4 + $0xa0] sm:$0xff]  ;;  %v218_v22 = vld [vmem:[#allocation4 + $0x98] sm:$0xff]  ;;  %v217_v23 = vld [vmem:[#allocation4 + $0x90] sm:$0xff] }
  0x3b   :  { %148 = vmatprep.subr.mxu1 %v95_v7  ;;  %v216_v24 = vld [vmem:[#allocation4 + $0x88] sm:$0xff]  ;;  %v215_v25 = vld [vmem:[#allocation4 + $0x80] sm:$0xff]  ;;  %v214_v26 = vld [vmem:[#allocation4 + $0x78] sm:$0xff] }
  0x3c   :  { %149 = vmatpush1.msra.mxu1 %v94_v8  ;;  %v213_v27 = vld [vmem:[#allocation4 + $0x70] sm:$0xff]  ;;  %v212_v28 = vld [vmem:[#allocation4 + $0x68] sm:$0xff]  ;;  %v211_v29 = vld [vmem:[#allocation4 + $0x60] sm:$0xff] }
  0x3d   :  { %648 = vmatmul.mubr.msk.f32.vlgmr.msra.gmra.mxu1 %vm114_vm0, %v93_v9  ;;  %275 = vmatprep.subr.mxu1 %v230_v10  ;;  %v210_v30 = vld [vmem:[#allocation4 + $0x58] sm:$0xff]  ;;  %v209_v31 = vld [vmem:[#allocation4 + $0x50] sm:$0xff]  ;;  %v208_v32 = vld [vmem:[#allocation4 + $0x48] sm:$0xff] }
  0x3e   :  { %276 = vmatpush1.msra.mxu1 %v229_v11  ;;  %v207_v33 = vld [vmem:[#allocation4 + $0x40] sm:$0xff]  ;;  %v206_v34 = vld [vmem:[#allocation4 + $0x38] sm:$0xff]  ;;  %v205_v35 = vld [vmem:[#allocation4 + $0x30] sm:$0xff] }
  0x3f   :  { %277 = vmatprep.subr.mxu1 %v228_v12  ;;  %v204_v36 = vld [vmem:[#allocation4 + $0x28] sm:$0xff]  ;;  %v203_v37 = vld [vmem:[#allocation4 + $0x20] sm:$0xff]  ;;  %v202_v38 = vld [vmem:[#allocation4 + $0x18] sm:$0xff] }
  0x40   :  { %278 = vmatpush1.msra.mxu1 %v227_v13  ;;  %v201_v39 = vld [vmem:[#allocation4 + $0x10] sm:$0xff]  ;;  %v200_v40 = vld [vmem:[#allocation4 + $0x8] sm:$0xff]  ;;  %v199_v41 = vld [vmem:[#allocation4] sm:$0xff] }
  0x41   :  { %279 = vmatprep.subr.mxu1 %v226_v14  ;;  %v262_v42 = vld [vmem:[#allocation4 + $0x1f8] sm:$0xff]  ;;  %v261_v43 = vld [vmem:[#allocation4 + $0x1f0] sm:$0xff]  ;;  %v260_v44 = vld [vmem:[#allocation4 + $0x1e8] sm:$0xff] }
  0x42   :  { %280 = vmatpush1.msra.mxu1 %v225_v15  ;;  %v259_v45 = vld [vmem:[#allocation4 + $0x1e0] sm:$0xff]  ;;  %v258_v46 = vld [vmem:[#allocation4 + $0x1d8] sm:$0xff]  ;;  %v257_v47 = vld [vmem:[#allocation4 + $0x1d0] sm:$0xff] }
  0x43   :  { %281 = vmatprep.subr.mxu1 %v224_v16  ;;  %v256_v48 = vld [vmem:[#allocation4 + $0x1c8] sm:$0xff]  ;;  %v255_v49 = vld [vmem:[#allocation4 + $0x1c0] sm:$0xff]  ;;  %v254_v50 = vld [vmem:[#allocation4 + $0x1b8] sm:$0xff] }
  0x44   :  { %282 = vmatpush1.msra.mxu1 %v223_v17  ;;  %v253_v51 = vld [vmem:[#allocation4 + $0x1b0] sm:$0xff]  ;;  %v252_v52 = vld [vmem:[#allocation4 + $0x1a8] sm:$0xff]  ;;  %v251_v53 = vld [vmem:[#allocation4 + $0x1a0] sm:$0xff] }
  0x45   :  { %283 = vmatprep.subr.mxu1 %v222_v18  ;;  %v250_v54 = vld [vmem:[#allocation4 + $0x198] sm:$0xff]  ;;  %v249_v55 = vld [vmem:[#allocation4 + $0x190] sm:$0xff]  ;;  %v248_v56 = vld [vmem:[#allocation4 + $0x188] sm:$0xff] }
  0x46   :  { %284 = vmatpush1.msra.mxu1 %v221_v19  ;;  %v247_v57 = vld [vmem:[#allocation4 + $0x180] sm:$0xff]  ;;  %v246_v58 = vld [vmem:[#allocation4 + $0x178] sm:$0xff]  ;;  %v245_v59 = vld [vmem:[#allocation4 + $0x170] sm:$0xff]  ;;  %v104_v19 = vlaneseq }
  0x47   :  { %285 = vmatprep.subr.mxu1 %v220_v20  ;;  %v244_v60 = vld [vmem:[#allocation4 + $0x168] sm:$0xff]  ;;  %v243_v61 = vld [vmem:[#allocation4 + $0x160] sm:$0xff]  ;;  %v242_v62 = vld [vmem:[#allocation4 + $0x158] sm:$0xff] }
  0x48   :  { %286 = vmatpush1.msra.mxu1 %v219_v21  ;;  %v241_v63 = vld [vmem:[#allocation4 + $0x150] sm:$0xff]  ;;  %v240_v1 = vld [vmem:[#allocation4 + $0x148] sm:$0xff]  ;;  %v239_v2 = vld [vmem:[#allocation4 + $0x140] sm:$0xff]  ;;  %v947_v20 = vshrl.u32 %v104_v19, 7 }
  0x49   :  { %287 = vmatprep.subr.mxu1 %v218_v22  ;;  %v238_v3 = vld [vmem:[#allocation4 + $0x138] sm:$0xff]  ;;  %v237_v4 = vld [vmem:[#allocation4 + $0x130] sm:$0xff]  ;;  %v236_v5 = vld [vmem:[#allocation4 + $0x128] sm:$0xff] }
  0x4a   :  { %288 = vmatpush1.msra.mxu1 %v217_v23  ;;  %v235_v6 = vld [vmem:[#allocation4 + $0x120] sm:$0xff]  ;;  %v234_v7 = vld [vmem:[#allocation4 + $0x118] sm:$0xff]  ;;  %v233_v8 = vld [vmem:[#allocation4 + $0x110] sm:$0xff]  ;;  %v106_v21 = vsub.s32 0, %v947_v20  ;;  %v110_v23 = vsub.s32 1, %v947_v20 }
  0x4b   :  { %289 = vmatprep.subr.mxu1 %v216_v24  ;;  %v232_v9 = vld [vmem:[#allocation4 + $0x108] sm:$0xff]  ;;  %v231_v10 = vld [vmem:[#allocation4 + $0x100] sm:$0xff]  ;;  %v387_v13 = vld [vmem:[#allocation6 + $0xf8] sm:$0xff] }
  0x4c   :  { %290 = vmatpush1.msra.mxu1 %v215_v25  ;;  %v389_v11 = vld [vmem:[%s1002_s7] sm:$0xff]  ;;  %v371_v14 = vld [vmem:[#allocation6 + $0x78] sm:$0xff]  ;;  %v386_v15 = vld [vmem:[#allocation6 + $0xf0] sm:$0xff] }
  0x4d   :  { %291 = vmatprep.subr.mxu1 %v214_v26  ;;  %v388_v12 = vld [vmem:[%s996_s1] sm:$0xff]  ;;  %707 = vmatpush3.msra.mxu0 %v389_v11  ;;  %v370_v16 = vld [vmem:[#allocation6 + $0x70] sm:$0xff]  ;;  %v385_v17 = vld [vmem:[#allocation6 + $0xe8] sm:$0xff] }
  0x4e   :  { %292 = vmatpush1.msra.mxu1 %v213_v27  ;;  %709 = vmatmul.mubr.msk.f32.vlgmr.msra.gmra.mxu0 %vm390_vm1, %v388_v12  ;;  %v369_v18 = vld [vmem:[#allocation6 + $0x68] sm:$0xff]  ;;  %v102_v22 = vld [vmem:[%s998_s3] sm:$0x3]  ;;  %v561_v20 = vld [vmem:[#allocation7 + $0x70] sm:$0xff] }
  0x4f   :  { %293 = vmatprep.subr.mxu1 %v212_v28  ;;  %654 = vmatprep.subr.mxu0 %v387_v13  ;;  %v107_v24 = vrot.slane %v102_v22, %v106_v21  ;;  %v111_v25 = vrot.slane %v102_v22, %v110_v23 }
  0x50   :  { %294 = vmatpush1.msra.mxu1 %v211_v29  ;;  %655 = vmatpush3.msra.mxu0 %v371_v14 }
  0x51   :  { %295 = vmatprep.subr.mxu1 %v210_v30  ;;  %656 = vmatprep.subr.mxu0 %v386_v15 }
  0x52   :  { %296 = vmatpush1.msra.mxu1 %v209_v31  ;;  %657 = vmatpush3.msra.mxu0 %v370_v16 }
  0x53   :  { %297 = vmatprep.subr.mxu1 %v208_v32  ;;  %658 = vmatprep.subr.mxu0 %v385_v17 }
  0x54   :  { %298 = vmatpush1.msra.mxu1 %v207_v33  ;;  %659 = vmatpush3.msra.mxu0 %v369_v18 }
  0x55   :  { %299 = vmatprep.subr.mxu1 %v206_v34 }
  0x56   :  { %300 = vmatpush1.msra.mxu1 %v205_v35 }
  0x57   :  { %301 = vmatprep.subr.mxu1 %v204_v36 }
  0x58   :  { %302 = vmatpush1.msra.mxu1 %v203_v37 }
  0x59   :  { %303 = vmatprep.subr.mxu1 %v202_v38 }
  0x5a   :  { %304 = vmatpush1.msra.mxu1 %v201_v39 }
  0x5b   :  { %305 = vmatprep.subr.mxu1 %v200_v40  ;;  %v384_v40 = vld [vmem:[#allocation6 + $0xe0] sm:$0xff] }
  0x5c   :  { %306 = vmatpush1.msra.mxu1 %v199_v41  ;;  %660 = vmatprep.subr.mxu0 %v384_v40  ;;  %v368_v41 = vld [vmem:[#allocation6 + $0x60] sm:$0xff] }
  0x5d   :  { %307 = vmatprep.subr.mxu1 %v262_v42  ;;  %661 = vmatpush3.msra.mxu0 %v368_v41  ;;  %v383_v42 = vld [vmem:[#allocation6 + $0xd8] sm:$0xff]  ;;  %v650_v41 = vld [vmem:[%s1003_s8] ss:$0 sm:$0xff] }
  0x5e   :  { %308 = vmatpush2.msra.mxu1 %v261_v43  ;;  %662 = vmatprep.subr.mxu0 %v383_v42  ;;  %v367_v43 = vld [vmem:[#allocation6 + $0x58] sm:$0xff] }
  0x5f   :  { %309 = vmatprep.subr.mxu1 %v260_v44  ;;  %663 = vmatpush3.msra.mxu0 %v367_v43  ;;  %v382_v44 = vld [vmem:[#allocation6 + $0xd0] sm:$0xff] }
  0x60   :  { %310 = vmatpush2.msra.mxu1 %v259_v45  ;;  %664 = vmatprep.subr.mxu0 %v382_v44  ;;  %v366_v45 = vld [vmem:[#allocation6 + $0x50] sm:$0xff] }
  0x61   :  { %311 = vmatprep.subr.mxu1 %v258_v46  ;;  %665 = vmatpush3.msra.mxu0 %v366_v45  ;;  %v381_v46 = vld [vmem:[#allocation6 + $0xc8] sm:$0xff] }
  0x62   :  { %312 = vmatpush2.msra.mxu1 %v257_v47  ;;  %666 = vmatprep.subr.mxu0 %v381_v46  ;;  %v365_v47 = vld [vmem:[#allocation6 + $0x48] sm:$0xff] }
  0x63   :  { %313 = vmatprep.subr.mxu1 %v256_v48  ;;  %667 = vmatpush3.msra.mxu0 %v365_v47  ;;  %v380_v48 = vld [vmem:[#allocation6 + $0xc0] sm:$0xff] }
  0x64   :  { %314 = vmatpush2.msra.mxu1 %v255_v49  ;;  %668 = vmatprep.subr.mxu0 %v380_v48  ;;  %v364_v49 = vld [vmem:[#allocation6 + $0x40] sm:$0xff] }
  0x65   :  { %315 = vmatprep.subr.mxu1 %v254_v50  ;;  %669 = vmatpush3.msra.mxu0 %v364_v49  ;;  %v379_v50 = vld [vmem:[#allocation6 + $0xb8] sm:$0xff] }
  0x66   :  { %316 = vmatpush2.msra.mxu1 %v253_v51  ;;  %670 = vmatprep.subr.mxu0 %v379_v50  ;;  %v363_v51 = vld [vmem:[#allocation6 + $0x38] sm:$0xff] }
  0x67   :  { %317 = vmatprep.subr.mxu1 %v252_v52  ;;  %671 = vmatpush3.msra.mxu0 %v363_v51  ;;  %v378_v52 = vld [vmem:[#allocation6 + $0xb0] sm:$0xff] }
  0x68   :  { %318 = vmatpush2.msra.mxu1 %v251_v53  ;;  %672 = vmatprep.subr.mxu0 %v378_v52  ;;  %v362_v53 = vld [vmem:[#allocation6 + $0x30] sm:$0xff] }
  0x69   :  { %319 = vmatprep.subr.mxu1 %v250_v54  ;;  %673 = vmatpush3.msra.mxu0 %v362_v53  ;;  %v377_v54 = vld [vmem:[#allocation6 + $0xa8] sm:$0xff] }
  0x6a   :  { %320 = vmatpush2.msra.mxu1 %v249_v55  ;;  %674 = vmatprep.subr.mxu0 %v377_v54  ;;  %v361_v55 = vld [vmem:[#allocation6 + $0x28] sm:$0xff] }
  0x6b   :  { %321 = vmatprep.subr.mxu1 %v248_v56  ;;  %675 = vmatpush3.msra.mxu0 %v361_v55  ;;  %v376_v56 = vld [vmem:[#allocation6 + $0xa0] sm:$0xff] }
  0x6c   :  { %322 = vmatpush2.msra.mxu1 %v247_v57  ;;  %676 = vmatprep.subr.mxu0 %v376_v56  ;;  %v360_v57 = vld [vmem:[#allocation6 + $0x20] sm:$0xff] }
  0x6d   :  { %323 = vmatprep.subr.mxu1 %v246_v58  ;;  %677 = vmatpush3.msra.mxu0 %v360_v57  ;;  %v375_v58 = vld [vmem:[#allocation6 + $0x98] sm:$0xff] }
  0x6e   :  { %324 = vmatpush2.msra.mxu1 %v245_v59  ;;  %678 = vmatprep.subr.mxu0 %v375_v58  ;;  %v359_v59 = vld [vmem:[#allocation6 + $0x18] sm:$0xff] }
  0x6f   :  { %325 = vmatprep.subr.mxu1 %v244_v60  ;;  %679 = vmatpush3.msra.mxu0 %v359_v59  ;;  %v374_v60 = vld [vmem:[#allocation6 + $0x90] sm:$0xff] }
  0x70   :  { %326 = vmatpush2.msra.mxu1 %v243_v61  ;;  %680 = vmatprep.subr.mxu0 %v374_v60  ;;  %v358_v61 = vld [vmem:[#allocation6 + $0x10] sm:$0xff] }
  0x71   :  { %327 = vmatprep.subr.mxu1 %v242_v62  ;;  %681 = vmatpush3.msra.mxu0 %v358_v61  ;;  %v373_v62 = vld [vmem:[#allocation6 + $0x88] sm:$0xff] }
  0x72   :  { %328 = vmatpush2.msra.mxu1 %v241_v63  ;;  %v357_v63 = vld [vmem:[#allocation6 + $0x8] sm:$0xff]  ;;  %682 = vmatprep.subr.mxu0 %v373_v62 }
  0x73   :  { %329 = vmatprep.subr.mxu1 %v240_v1  ;;  %v372_v1 = vld [vmem:[#allocation6 + $0x80] sm:$0xff]  ;;  %683 = vmatpush3.msra.mxu0 %v357_v63 }
  0x74   :  { %330 = vmatpush2.msra.mxu1 %v239_v2  ;;  %v356_v2 = vld [vmem:[#allocation6] sm:$0xff]  ;;  %684 = vmatprep.subr.mxu0 %v372_v1 }
  0x75   :  { %331 = vmatprep.subr.mxu1 %v238_v3  ;;  %685 = vmatpush3.msra.mxu0 %v356_v2 }
  0x76   :  { %332 = vmatpush2.msra.mxu1 %v237_v4  ;;  %711 = vmatprep.subr.mxu0 %v860_v0 }
  0x77   :  { %333 = vmatprep.subr.mxu1 %v236_v5  ;;  %v263_v5 = vld [vmem:[%s1000_s5] sm:$0x3] }
  0x78   :  { %334 = vmatpush2.msra.mxu1 %v235_v6  ;;  %v268_v6 = vrot.slane %v263_v5, %v106_v21  ;;  %v562_v21 = vld [vmem:[#allocation7 + $0x78] sm:$0xff] }
  0x79   :  { %335 = vmatprep.subr.mxu1 %v234_v7  ;;  %v272_v7 = vrot.slane %v263_v5, %v110_v23  ;;  %v560_v23 = vld [vmem:[#allocation7 + $0x68] sm:$0xff] }
  0x7a   :  { %336 = vmatpush2.msra.mxu1 %v233_v8 }
  0x7b   :  { %337 = vmatprep.subr.mxu1 %v232_v9 }
  0x7c   :  { %338 = vmatpush2.msra.mxu1 %v231_v10 }
  0xfd   :  { %v184_v26 = vpop.f32.mrf.mxu1 }
  0xfe   :  { %v185_v27 = vadd.f32 %v184_v26, %v107_v24  ;;  %v558_v26 = vld [vmem:[#allocation7 + $0x58] sm:$0xff] }
  0xff   :  { %v186_v28 = vpop.f32.mrf.mxu1 }
 0x100   :  { %v191_v29 = vmul.f32 0.70710677, %v185_v27  ;;  %v187_v30 = vadd.f32 %v186_v28, %v111_v25  ;;  %v189_v37 = vmul.f32 0.5, %v185_v27  ;;  %v559_v25 = vld [vmem:[#allocation7 + $0x60] sm:$0xff]  ;;  %v557_v27 = vld [vmem:[#allocation7 + $0x50] sm:$0xff]  ;;  %v556_v28 = vld [vmem:[#allocation7 + $0x48] sm:$0xff] }
 0x102   :  { %756 = verf.f32 %v191_v29  ;;  %v192_v31 = vmul.f32 0.70710677, %v187_v30  ;;  %v190_v35 = vmul.f32 0.5, %v187_v30  ;;  %v555_v29 = vld [vmem:[#allocation7 + $0x40] sm:$0xff]  ;;  %v554_v30 = vld [vmem:[#allocation7 + $0x38] sm:$0xff] }
 0x104   :  { %758 = verf.f32 %v192_v31  ;;  %v553_v31 = vld [vmem:[#allocation7 + $0x30] sm:$0xff] }
 0x10e   :  { %v958_v3 = vpop.f32.mrf.mxu0 }
 0x10f   :  { %v757_v32 = vpop.eup %756 }
 0x110   :  { %v195_v34 = vadd.f32 1.0, %v757_v32  ;;  %v710_v4 = vpop.f32.mrf.mxu0  ;;  %v552_v32 = vld [vmem:[#allocation7 + $0x28] sm:$0xff] }
 0x111   :  { %v759_v33 = vpop.eup %758 }
 0x112   :  { %v196_v36 = vadd.f32 1.0, %v759_v33  ;;  %v197_v39 = vmul.f32 %v195_v34, %v189_v37  ;;  %v551_v33 = vld [vmem:[#allocation7 + $0x20] sm:$0xff]  ;;  %v550_v34 = vld [vmem:[#allocation7 + $0x18] sm:$0xff] }
 0x113   :  { %v547_v37 = vld [vmem:[#allocation7] sm:$0xff] }
 0x114   :  { %v198_v38 = vmul.f32 %v196_v36, %v190_v35  ;;  %v549_v35 = vld [vmem:[#allocation7 + $0x10] sm:$0xff]  ;;  %v548_v36 = vld [vmem:[#allocation7 + $0x8] sm:$0xff] }
 0x116   :  { %339 = vmatprep.mubr.f32.mxu1 %v198_v38 }
 0x117   :  { %340 = vmatmul.mubr.f32.vlgmr.msra.gmra.mxu1 %v197_v39 }
 0x1d7   :  { %v341_v8 = vpop.f32.mrf.mxu1 }
 0x1d8   :  { %v342_v9 = vadd.f32 %v341_v8, %v268_v6 }
 0x1d9   :  { %v343_v10 = vpop.f32.mrf.mxu1 }
 0x1da   :  { %v348_v11 = vmul.f32 0.70710677, %v342_v9  ;;  %v344_v12 = vadd.f32 %v343_v10, %v272_v7  ;;  %v346_v19 = vmul.f32 0.5, %v342_v9 }
 0x1dc   :  { %760 = verf.f32 %v348_v11  ;;  %v349_v13 = vmul.f32 0.70710677, %v344_v12  ;;  %v347_v17 = vmul.f32 0.5, %v344_v12 }
 0x1de   :  { %762 = verf.f32 %v349_v13 }
 0x1e9   :  { %v761_v14 = vpop.eup %760 }
 0x1ea   :  { %v352_v16 = vadd.f32 1.0, %v761_v14 }
 0x1eb   :  { %v763_v15 = vpop.eup %762 }
 0x1ec   :  { %v353_v18 = vadd.f32 1.0, %v763_v15  ;;  %v354_v24 = vmul.f32 %v352_v16, %v346_v19 }
 0x1ee   :  { %v355_v22 = vmul.f32 %v353_v18, %v347_v17 }
 0x1f0   :  { %528 = vmatprep.mubr.f32.mxu0 %v355_v22 }
 0x1f1   :  { %529 = vmatmul.mubr.f32.vlgmr.msra.gmra.mxu0 %v354_v24 }
 0x1f2   :  { %712 = vmatpush3.msra.mxu0 %v562_v21  ;;  %743 = vmatprep.mubr.msk.f32.mxu0 %vm861_vm2, %v860_v0 }
 0x1f3   :  { %713 = vmatprep.subr.mxu0 %v860_v0 }
 0x1f4   :  { %714 = vmatpush3.msra.mxu0 %v561_v20 }
 0x1f5   :  { %715 = vmatprep.subr.mxu0 %v860_v0 }
 0x1f6   :  { %716 = vmatpush3.msra.mxu0 %v560_v23 }
 0x1f7   :  { %717 = vmatprep.subr.mxu0 %v860_v0 }
 0x1f8   :  { %718 = vmatpush3.msra.mxu0 %v559_v25 }
 0x1f9   :  { %719 = vmatprep.subr.mxu0 %v860_v0 }
 0x1fa   :  { %720 = vmatpush3.msra.mxu0 %v558_v26 }
 0x1fb   :  { %721 = vmatprep.subr.mxu0 %v860_v0 }
 0x1fc   :  { %722 = vmatpush3.msra.mxu0 %v557_v27 }
 0x1fd   :  { %723 = vmatprep.subr.mxu0 %v860_v0 }
 0x1fe   :  { %724 = vmatpush3.msra.mxu0 %v556_v28 }
 0x1ff   :  { %725 = vmatprep.subr.mxu0 %v860_v0 }
 0x200   :  { %726 = vmatpush3.msra.mxu0 %v555_v29 }
 0x201   :  { %727 = vmatprep.subr.mxu0 %v860_v0 }
 0x202   :  { %728 = vmatpush3.msra.mxu0 %v554_v30 }
 0x203   :  { %729 = vmatprep.subr.mxu0 %v860_v0 }
 0x204   :  { %730 = vmatpush3.msra.mxu0 %v553_v31 }
 0x205   :  { %731 = vmatprep.subr.mxu0 %v860_v0 }
 0x206   :  { %732 = vmatpush3.msra.mxu0 %v552_v32 }
 0x207   :  { %733 = vmatprep.subr.mxu0 %v860_v0 }
 0x208   :  { %734 = vmatpush3.msra.mxu0 %v551_v33 }
 0x209   :  { %735 = vmatprep.subr.mxu0 %v860_v0 }
 0x20a   :  { %736 = vmatpush3.msra.mxu0 %v550_v34 }
 0x20b   :  { %737 = vmatprep.subr.mxu0 %v860_v0 }
 0x20c   :  { %738 = vmatpush3.msra.mxu0 %v549_v35 }
 0x20d   :  { %739 = vmatprep.subr.mxu0 %v860_v0 }
 0x20e   :  { %740 = vmatpush3.msra.mxu0 %v548_v36 }
 0x20f   :  { %741 = vmatprep.subr.mxu0 %v860_v0  ;;  %v651_v0 = vld [vmem:[%s1005_s10] ss:$0 sm:$0xff] }
 0x210   :  { %742 = vmatpush3.msra.mxu0 %v547_v37 }
 0x2b1   :  { %v686_v38 = vpop.f32.mrf.mxu0 }
 0x2b3   :  { %v687_v39 = vpop.f32.mrf.mxu0 }
 0x2b4   :  { %v688_v40 = vadd.f32 %v687_v39, %v686_v38 }
 0x2b6   :  { %v531_v42 = vadd.f32 %v688_v40, %v958_v3 }
 0x2b8   :  { %v541_v43 = vadd.f32 %v650_v41, %v531_v42 }
 0x2ba   :  { %v543_v44 = vmul.f32 0.70710677, %v541_v43  ;;  %v542_v46 = vmul.f32 0.5, %v541_v43 }
 0x2bc   :  { %764 = verf.f32 %v543_v44 }
 0x2c9   :  { %v765_v45 = vpop.eup %764 }
 0x2ca   :  { %v545_v47 = vadd.f32 1.0, %v765_v45 }
 0x2cc   :  { %v546_v48 = vmul.f32 %v545_v47, %v542_v46 }
 0x2ce   :  { %744 = vmatmul.mubr.f32.vlgmr.msra.gmra.mxu0 %v546_v48 }
 0x38e   :  { %v636_v49 = vpop.f32.mrf.mxu0 }
 0x38f   :  { %v637_v50 = vadd.f32 %v651_v0, %v636_v49 }
 0x390   :  { %v745_v51 = vpop.f32.mrf.mxu0 }
 0x391   :  { %640 = vst [vmem:[%s1006_s11] sm:$0xff] %v637_v50 }
 0x392   :  { %645 = vsyncpa [#allocation3], 1 }
 0x393   :  { %646 = vsyncpa [#allocation5], 1 }
 0x394   :  { %647 = vsyncpa [#allocation8], 1 }

</bundles_post_ra>
